<compile_context>
chip_gen: v5e
topology: v5e:2x2
jax: 0.10.0
libtpu: 0.0.40
codegen_flags: <defaults>
</compile_context>

<pallas_src>
import functools

import jax
import jax.numpy as jnp
from jax import lax
from jax.experimental import pallas as pl
from jax.experimental.pallas import tpu as pltpu

LN_EPS = 1e-5
_MAX_ROW_TILE = 4096
_ROW_ALIGN = 16                      # sublane alignment (covers f32 and bf16 tiles)
_VMEM_BUDGET = 12 * 1024 * 1024      # conservative: under v5e's 16 MiB scoped default


def _round_up(v, m):
    return ((v + m - 1) // m) * m


def hashing_encoder_kernel(x_ref, w_ref, p_ref, o_ref, *, inv_k):
    # Cast operands to bf16 in-kernel (free under the memory bound) and hit the
    # MXU with f32 accumulation.
    x = x_ref[...].astype(jnp.bfloat16)
    w = w_ref[...].astype(jnp.bfloat16)
    y = jnp.dot(x, w, preferred_element_type=jnp.float32)
    y = y + p_ref[0:1, :]                              # bias, broadcast over rows

    # One-pass LayerNorm over the true k_bits features.  Padded lanes hold exact
    # zeros (zero W columns + zero bias) so they contribute nothing to the sums;
    # we divide by the true feature count via inv_k.  The two reductions are
    # independent XLU ops (shorter dependency chain than the two-pass form).
    s = jnp.sum(y, axis=-1, keepdims=True)
    s2 = jnp.sum(y * y, axis=-1, keepdims=True)
    mean = s * inv_k
    var = jnp.maximum(s2 * inv_k - mean * mean, 0.0)   # guard against cancellation
    y = (y - mean) * lax.rsqrt(var + LN_EPS)

    # LayerNorm affine + tanh (EUP).  Padded gamma/beta are zero -> padded lanes
    # come out as tanh(0)=0 (and are sliced away only if k_bits % 128 != 0).
    o_ref[...] = jnp.tanh(y * p_ref[1:2, :] + p_ref[2:3, :]).astype(o_ref.dtype)


def hashing_encoder(x, w, b, gamma, beta, *, tm=None, out_dtype=jnp.bfloat16):
    """x: (B, org_dim) f32; w: (org_dim, k_bits); b, gamma, beta: (k_bits,).

    Returns (B, k_bits) out_dtype = tanh(LayerNorm(x @ w + b)).
    """
    B, org_dim = x.shape
    k_bits = w.shape[1]
    out_bytes = jnp.dtype(out_dtype).itemsize

    # ---- feature padding: lane-dense (multiple of 128) output / W columns -----
    # (Only touches the tiny parameter tensors, never x or the output rows.)
    k_pad = max(128, _round_up(k_bits, 128))
    if k_pad != k_bits:
        pw = k_pad - k_bits
        w = jnp.pad(w, ((0, 0), (0, pw)))
        b = jnp.pad(b, (0, pw))
        gamma = jnp.pad(gamma, (0, pw))
        beta = jnp.pad(beta, (0, pw))

    # ---- row tile: VMEM-budgeted, capped, >= ~4 blocks for large B ------------
    if tm is None:
        fixed = 2 * org_dim * k_pad * 4 + 2 * 3 * k_pad * 4        # W + params (f32, dbl-buf)
        per_row = 2 * (org_dim * 4) + 2 * (k_pad * out_bytes)      # x + out, dbl-buffered
        tm_vmem = max(_ROW_ALIGN, (_VMEM_BUDGET - fixed) // per_row)
        tm_cap = min(_MAX_ROW_TILE, tm_vmem)
        tm_target = _round_up(pl.cdiv(B, 4), _ROW_ALIGN)           # >=4 blocks when B is big
        tm = max(_ROW_ALIGN, (min(tm_cap, tm_target) // _ROW_ALIGN) * _ROW_ALIGN)
    if tm >= B:
        tm = B                                    # single block; block == full dim is legal
    else:
        tm = max(_ROW_ALIGN, _round_up(tm, _ROW_ALIGN))
        if tm >= B:
            tm = B

    grid = (pl.cdiv(B, tm),)                      # ragged last block handled by Pallas
    params = jnp.stack([b, gamma, beta], axis=0).astype(jnp.float32)   # (3, k_pad)
    kernel = functools.partial(hashing_encoder_kernel, inv_k=1.0 / k_bits)

    out = pl.pallas_call(
        kernel,
        out_shape=jax.ShapeDtypeStruct((B, k_pad), out_dtype),
        grid_spec=pltpu.PrefetchScalarGridSpec(
            num_scalar_prefetch=0,
            grid=grid,
            in_specs=[
                pl.BlockSpec((tm, org_dim), lambda i: (i, 0)),       # x tile (f32)
                pl.BlockSpec((org_dim, k_pad), lambda i: (0, 0)),    # W (resident)
                pl.BlockSpec((3, k_pad), lambda i: (0, 0)),          # bias/gamma/beta
            ],
            out_specs=pl.BlockSpec((tm, k_pad), lambda i: (i, 0)),
        ),
        compiler_params=pltpu.CompilerParams(
            dimension_semantics=("parallel",),
        ),
        cost_estimate=pl.CostEstimate(
            flops=2 * B * org_dim * k_pad,
            transcendentals=B * k_pad + B,               # tanh + rsqrt
            bytes_accessed=(B * org_dim * 4 + org_dim * k_pad * 4
                            + 3 * k_pad * 4 + B * k_pad * out_bytes),
        ),
    )(x, w.astype(jnp.float32), params)

    if k_pad != k_bits:
        out = out[:, :k_bits]
    return out


def hashing_encoder_ref(x, w, b, gamma, beta, *, matmul_dtype=jnp.float32):
    """Pure-JAX reference; matmul_dtype lets us match the kernel's bf16 MXU path."""
    y = jnp.dot(x.astype(matmul_dtype), w.astype(matmul_dtype),
                preferred_element_type=jnp.float32) + b
    mean = jnp.mean(y, axis=-1, keepdims=True)
    var = jnp.mean((y - mean) ** 2, axis=-1, keepdims=True)
    y = (y - mean) * lax.rsqrt(var + LN_EPS)
    return jnp.tanh(y * gamma + beta)


if __name__ == "__main__":
    # Small shapes consistent with the module: batch=8, org_dim=32, k_bits=128
    B, ORG_DIM, K_BITS = 8, 32, 128

    key = jax.random.PRNGKey(0)
    kx, kw, kb = jax.random.split(key, 3)

    x = jax.random.normal(kx, (B, ORG_DIM), dtype=jnp.float32)

    # PyTorch-like Linear init; LayerNorm default gamma=1, beta=0
    bound = 1.0 / (ORG_DIM ** 0.5)
    w = jax.random.uniform(kw, (ORG_DIM, K_BITS), jnp.float32, -bound, bound)
    b = jax.random.uniform(kb, (K_BITS,), jnp.float32, -bound, bound)
    gamma = jnp.ones((K_BITS,), dtype=jnp.float32)
    beta = jnp.zeros((K_BITS,), dtype=jnp.float32)

    out = jax.block_until_ready(hashing_encoder(x, w, b, gamma, beta))
    assert out.shape == (B, K_BITS)
    assert out.dtype == jnp.bfloat16

    # Tight check vs a reference using the same bf16 operand precision
    # (tolerance also covers bf16 rounding of the tanh output, <= ~8e-3).
    ref_bf16 = hashing_encoder_ref(x, w, b, gamma, beta, matmul_dtype=jnp.bfloat16)
    assert jnp.allclose(out.astype(jnp.float32), ref_bf16, atol=1.5e-2, rtol=1e-2), \
        "mismatch vs bf16-op reference"

    # Loose sanity check against full-f32 math (bf16 operand/output rounding only).
    ref_f32 = hashing_encoder_ref(x, w, b, gamma, beta)
    assert jnp.allclose(out.astype(jnp.float32), ref_f32, atol=5e-2, rtol=5e-2), \
        "mismatch vs f32 reference"

    # Ragged batch (B % tm != 0) exercises the masked last-block store path.
    B2 = 37
    x2 = jax.random.normal(jax.random.PRNGKey(1), (B2, ORG_DIM), dtype=jnp.float32)
    out2 = jax.block_until_ready(hashing_encoder(x2, w, b, gamma, beta, tm=16))
    assert out2.shape == (B2, K_BITS)
    ref2 = hashing_encoder_ref(x2, w, b, gamma, beta, matmul_dtype=jnp.bfloat16)
    assert jnp.allclose(out2.astype(jnp.float32), ref2, atol=1.5e-2, rtol=1e-2), \
        "mismatch on ragged batch"

    print("KERNEL_OK")
</pallas_src>

<mosaic_0001>
module attributes {stable_mosaic.version = 11 : i64} {
  func.func @hashing_encoder_kernel(%arg0: i32, %arg1: memref<8x32xf32, #tpu.memory_space<vmem>>, %arg2: memref<32x128xf32, #tpu.memory_space<vmem>>, %arg3: memref<3x128xf32, #tpu.memory_space<vmem>>, %arg4: memref<8x128xbf16, #tpu.memory_space<vmem>>) attributes {dimension_semantics = [#tpu.dimension_semantics<parallel>], iteration_bounds = array<i64: 1>, scalar_prefetch = 0 : i64, scratch_operands = 0 : i64, tpu.core_type = #tpu.core_type<tc>, window_params = [{transform_indices = @transform_0, window_bounds = array<i64: 8, 32>}, {pipeline_mode = #tpu.pipeline_mode<synchronous>, transform_indices = @transform_1, window_bounds = array<i64: 32, 128>}, {pipeline_mode = #tpu.pipeline_mode<synchronous>, transform_indices = @transform_2, window_bounds = array<i64: 3, 128>}, {transform_indices = @transform_3, window_bounds = array<i64: 8, 128>}]} {
    %c0 = arith.constant 0 : index
    %c0_0 = arith.constant 0 : index
    %0 = vector.load %arg1[%c0, %c0_0] : memref<8x32xf32, #tpu.memory_space<vmem>>, vector<8x32xf32>
    %1 = arith.truncf %0 : vector<8x32xf32> to vector<8x32xbf16>
    %c0_1 = arith.constant 0 : index
    %c0_2 = arith.constant 0 : index
    %2 = vector.load %arg2[%c0_1, %c0_2] : memref<32x128xf32, #tpu.memory_space<vmem>>, vector<32x128xf32>
    %3 = arith.truncf %2 : vector<32x128xf32> to vector<32x128xbf16>
    %cst = arith.constant dense<0.000000e+00> : vector<8x128xf32>
    %4 = tpu.matmul %1, %3, %cst {dimension_numbers = #tpu.dot_dimension_numbers<[1], [0], [0], [1], [0, 0, 1, 1], [], []>} : vector<8x32xbf16>, vector<32x128xbf16>, vector<8x128xf32> -> vector<8x128xf32>
    %c0_3 = arith.constant 0 : index
    %c0_4 = arith.constant 0 : index
    %5 = vector.load %arg3[%c0_3, %c0_4] : memref<3x128xf32, #tpu.memory_space<vmem>>, vector<1x128xf32>
    %6 = vector.broadcast %5 : vector<1x128xf32> to vector<8x128xf32>
    %7 = arith.addf %4, %6 : vector<8x128xf32>
    %cst_5 = arith.constant dense<0.000000e+00> : vector<8xf32>
    %8 = vector.multi_reduction <add>, %7, %cst_5 [1] : vector<8x128xf32> to vector<8xf32>
    %9 = vector.shape_cast %8 : vector<8xf32> to vector<8x1xf32>
    %10 = arith.mulf %7, %7 : vector<8x128xf32>
    %cst_6 = arith.constant dense<0.000000e+00> : vector<8xf32>
    %11 = vector.multi_reduction <add>, %10, %cst_6 [1] : vector<8x128xf32> to vector<8xf32>
    %12 = vector.shape_cast %11 : vector<8xf32> to vector<8x1xf32>
    %cst_7 = arith.constant 7.812500e-03 : f32
    %13 = vector.broadcast %cst_7 : f32 to vector<8x1xf32>
    %14 = arith.mulf %9, %13 : vector<8x1xf32>
    %cst_8 = arith.constant 7.812500e-03 : f32
    %15 = vector.broadcast %cst_8 : f32 to vector<8x1xf32>
    %16 = arith.mulf %12, %15 : vector<8x1xf32>
    %17 = arith.mulf %14, %14 : vector<8x1xf32>
    %18 = arith.subf %16, %17 : vector<8x1xf32>
    %cst_9 = arith.constant 0.000000e+00 : f32
    %19 = vector.broadcast %cst_9 : f32 to vector<8x1xf32>
    %20 = arith.maximumf %18, %19 : vector<8x1xf32>
    %21 = vector.broadcast %14 : vector<8x1xf32> to vector<8x128xf32>
    %22 = arith.subf %7, %21 : vector<8x128xf32>
    %cst_10 = arith.constant 9.99999974E-6 : f32
    %23 = vector.broadcast %cst_10 : f32 to vector<8x1xf32>
    %24 = arith.addf %20, %23 : vector<8x1xf32>
    %25 = math.rsqrt %24 : vector<8x1xf32>
    %26 = vector.broadcast %25 : vector<8x1xf32> to vector<8x128xf32>
    %27 = arith.mulf %22, %26 : vector<8x128xf32>
    %c1 = arith.constant 1 : index
    %c0_11 = arith.constant 0 : index
    %28 = vector.load %arg3[%c1, %c0_11] : memref<3x128xf32, #tpu.memory_space<vmem>>, vector<1x128xf32>
    %29 = vector.broadcast %28 : vector<1x128xf32> to vector<8x128xf32>
    %30 = arith.mulf %27, %29 : vector<8x128xf32>
    %c2 = arith.constant 2 : index
    %c0_12 = arith.constant 0 : index
    %31 = vector.load %arg3[%c2, %c0_12] : memref<3x128xf32, #tpu.memory_space<vmem>>, vector<1x128xf32>
    %32 = vector.broadcast %31 : vector<1x128xf32> to vector<8x128xf32>
    %33 = arith.addf %30, %32 : vector<8x128xf32>
    %34 = math.tanh %33 : vector<8x128xf32>
    %35 = arith.truncf %34 : vector<8x128xf32> to vector<8x128xbf16>
    %c0_13 = arith.constant 0 : index
    %c0_14 = arith.constant 0 : index
    %36 = vector.load %arg4[%c0_13, %c0_14] : memref<8x128xbf16, #tpu.memory_space<vmem>>, vector<8x128xbf16>
    tpu.vector_store %arg4[%c0_13, %c0_14], %35 {strides = array<i32>} : memref<8x128xbf16, #tpu.memory_space<vmem>>, vector<8x128xbf16>,
    return
  }
  func.func @transform_0(%arg0: i32) -> (i32, i32) {
    %c0_i32 = arith.constant 0 : i32
    %c0_i32_0 = arith.constant 0 : i32
    return %arg0, %c0_i32 : i32, i32
  }
  func.func @transform_1(%arg0: i32) -> (i32, i32) {
    %c0_i32 = arith.constant 0 : i32
    %c0_i32_0 = arith.constant 0 : i32
    %c0_i32_1 = arith.constant 0 : i32
    return %c0_i32, %c0_i32_0 : i32, i32
  }
  func.func @transform_2(%arg0: i32) -> (i32, i32) {
    %c0_i32 = arith.constant 0 : i32
    %c0_i32_0 = arith.constant 0 : i32
    %c0_i32_1 = arith.constant 0 : i32
    return %c0_i32, %c0_i32_0 : i32, i32
  }
  func.func @transform_3(%arg0: i32) -> (i32, i32) {
    %c0_i32 = arith.constant 0 : i32
    %c0_i32_0 = arith.constant 0 : i32
    return %arg0, %c0_i32 : i32, i32
  }
}

</mosaic_0001>

<bundles_post_ra>
// kernel: tpu_custom_call.1
= control target key start
LH: loop header
LB: loop body
LE: loop exit
PB: predicated region body
PF: predicated region fallthrough
CT: control target
= control target key end

     0   :  { %8 = vsyncpa [#allocation3], 0  ;;  %s290_s0 = inlined_call_operand.hbm [shape: f32[8,32], index: 0, kind: input, shape index: {}]   ;;  %s291_s1 = inlined_call_operand.hbm [shape: f32[32,128], index: 1, kind: input, shape index: {}]   ;;  %s292_s2 = inlined_call_operand.hbm [shape: f32[3,128], index: 2, kind: input, shape index: {}]   ;;  %s293_s3 = inlined_call_operand.hbm [shape: bf16[8,128], index: 3, kind: output, shape index: {}]  }
   0x1   :  { %9 = vsyncpa [#allocation6], 0  ;;  %s26_s14 = sshll.u32 %s291_s1, 4  ;;  %s27_s14 = int_to_ptr.hbm [resolvable:$true] %s26_s14 }
   0x2   :  { %10 = vsyncpa [#allocation4], 0  ;;  %s252_s15 = smov [#allocation5]   ;;  %s16_s19 = sshll.u32 %s290_s0, 4  ;;  %s17_s19 = int_to_ptr.hbm [resolvable:$true] %s16_s19 }
   0x3   :  { %s28_s16 = sshll.u32 %s252_s15, 4  ;;  %s253_s20 = smov 128   ;;  %s29_s16 = int_to_ptr.vmem [resolvable:$true] %s28_s16 }
   0x4   :  { %s254_s21 = smov 8   ;;  %s255_s22 = smov [#allocation2]  }
   0x5   :  { %34 = dma.hbm_to_vmem [thread:$0]  %s27_s14, 512, %s29_s16, [#allocation6], %s253_s20, %s253_s20, %s254_s21  }
   0x6   :  { %s18_s23 = sshll.u32 %s255_s22, 4  ;;  %s40_s26 = sshll.u32 %s292_s2, 4  ;;  %s19_s23 = int_to_ptr.vmem [resolvable:$true] %s18_s23  ;;  %s41_s26 = int_to_ptr.hbm [resolvable:$true] %s40_s26 }
   0x7   :  { %21 = dma.hbm_to_vmem [thread:$0]  %s17_s19, 128, %s19_s23, [#allocation3]  }
   0x8   :  { %s256_s1 = smov [#allocation7]  }
   0x9   :  { %s42_s27 = sshll.u32 %s256_s1, 4  ;;  %s43_s27 = int_to_ptr.vmem [resolvable:$true] %s42_s27 }
   0xa   :  { %45 = dma.hbm_to_vmem [thread:$0]  %s41_s26, 64, %s43_s27, [#allocation6]  }
   0xb   :  { %246 = dma.done.wait [#allocation3], 128  }
   0xc   :  { %247 = vsyncadd [#allocation3], 4294967168 }
   0xd   :  { %248 = dma.done.wait [#allocation6], 576  }
   0xe   :  { %249 = vsyncadd [#allocation6], 4294966720  ;;  %v63_v0 = vld [vmem:[#allocation5 + $0x10] sm:$0xff]  ;;  %v64_v1 = vld [vmem:[#allocation5 + $0x18] sm:$0xff]  ;;  %vm69_vm0 = vcmask 261120   ;;  %s257_s0 = smov [#allocation8]  }
   0xf   :  { %v61_v2 = vld [vmem:[#allocation5] sm:$0xff]  ;;  %v66_v3 = vpack.c.bf16 %v64_v1, %v63_v0  ;;  %v62_v4 = vld [vmem:[#allocation5 + $0x8] sm:$0xff]  ;;  %v59_v6 = vld [vmem:[#allocation2] sm:$0xff]  ;;  %s123_s2 = sshll.u32 %s257_s0, 4  ;;  %s125_s30 = sshll.u32 %s293_s3, 4  ;;  %s124_s2 = int_to_ptr.vmem [resolvable:$true] %s123_s2  ;;  %s126_s30 = int_to_ptr.hbm [resolvable:$true] %s125_s30 }
  0x10   :  { %v65_v5 = vpack.c.bf16 %v62_v4, %v61_v2  ;;  %v60_v7 = vpack.c.bf16 %v59_v6, %v59_v6  ;;  %v143_v8 = vld [vmem:[#allocation7] ss:$0 sm:$0xff]  ;;  %v144_v28 = vld [vmem:[#allocation7 + $0x1] ss:$0 sm:$0xff]  ;;  %v145_v31 = vld [vmem:[#allocation7 + $0x2] ss:$0 sm:$0xff] }
  0x11   :  { %79 = vmatpush.bf16.msra.mxu0 %v66_v3 }
  0x15   :  { %80 = vmatpush.bf16.msra.mxu0 %v65_v5 }
  0x18   :  { %136 = vmatmul.msk.bf16.vlgmr.msra.gmra.mxu0 %vm69_vm0, %v60_v7 }
  0x95   :  { %v82_v9 = vpop.f32.mrf.mxu0 }
  0x96   :  { %v83_v10 = vadd.f32 %v143_v8, %v82_v9 }
  0x98   :  { %86 = vadd.xlane.f32.xlu0 %v83_v10  ;;  %v88_v12 = vmul.f32 %v83_v10, %v83_v10 }
  0x9d   :  { %v84_v11 = vpop.f32.mrf.mxu0 }
  0xa0   :  { %89 = vadd.xlane.f32.xlu0 %v88_v12 }
 0x10b   :  { %v87_v13 = vpop.xlane.xlu0 %86 }
 0x10c   :  { %v91_v14 = vmul.f32 0.0078125, %v87_v13 }
 0x10e   :  { %v93_v16 = vmul.f32 %v91_v14, %v91_v14  ;;  %v96_v27 = vsub.f32 %v83_v10, %v91_v14 }
 0x113   :  { %v90_v15 = vpop.xlane.xlu0 %89 }
 0x114   :  { %v92_v17 = vmul.f32 0.0078125, %v90_v15 }
 0x116   :  { %v94_v18 = vsub.f32 %v92_v17, %v93_v16 }
 0x118   :  { %v95_v19 = vmax.f32 %v94_v18, 0.0 }
 0x11a   :  { %v97_v20 = vadd.f32 1e-05, %v95_v19 }
 0x11c   :  { %146 = vrsqrt.f32 %v97_v20  ;;  %vm104_vm2 = vweird.f32 %v97_v20 }
 0x122   :  { %v147_v21 = vpop.eup %146 }
 0x123   :  { %v99_v22 = vmul.f32 %v147_v21, %v97_v20  ;;  %vm105_vm1 = vweird.f32 %v147_v21 }
 0x124   :  { %vm106_vm3 = vmor %vm104_vm2, %vm105_vm1 }
 0x125   :  { %v100_v23 = vmul.f32 %v147_v21, %v99_v22 }
 0x127   :  { %v101_v24 = vmul.f32 0.5, %v100_v23 }
 0x129   :  { %v102_v25 = vsub.f32 1.5, %v101_v24 }
 0x12b   :  { %v103_v26 = vmul.f32 %v147_v21, %v102_v25 }
 0x12d   :  { %v107_v29 = vsel %vm106_vm3, %v147_v21, %v103_v26 }
 0x12e   :  { %v108_v30 = vmul.f32 %v107_v29, %v96_v27 }
 0x130   :  { %v111_v32 = vmul.f32 %v144_v28, %v108_v30 }
 0x132   :  { %v114_v33 = vadd.f32 %v145_v31, %v111_v32 }
 0x134   :  { %148 = vtanh.f32 %v114_v33 }
 0x13a   :  { %v149_v34 = vpop.eup %148 }
 0x13b   :  { %v116_v35 = vpack.c.bf16 %v149_v34, %v149_v34 }
 0x13d   :  { %117 = vst [vmem:[#allocation8] sm:$0xf] %v116_v35 }
 0x13e   :  { %128 = dma.vmem_to_hbm [thread:$0]  %s124_s2, 64, %s126_s30, [#allocation4]  }
 0x13f   :  { %250 = dma.done.wait [#allocation4], 64  }
 0x140   :  { %251 = vsyncadd [#allocation4], 4294967232 }
 0x141   :  { %133 = vsyncpa [#allocation3], 1 }
 0x142   :  { %134 = vsyncpa [#allocation6], 1 }
 0x143   :  { %135 = vsyncpa [#allocation4], 1 }

</bundles_post_ra>
